<compile_context>
chip_gen: v5e
topology: v5e:2x2
jax: 0.10.0
libtpu: 0.0.40
codegen_flags: <defaults>
</compile_context>

<pallas_src>
import jax
import jax.numpy as jnp
from jax import lax
from jax.experimental import pallas as pl
from jax.experimental.pallas import tpu as pltpu


# ----------------------------------------------------------------------------
# Kernels
# ----------------------------------------------------------------------------
def _segformer_mlp_kernel_fused(x_ref, w_ref, b_ref, o_ref):
    """Single k-pass: o = x_tile(tk,tm)^T @ w_tile(tk,tn) + b, no scratch."""
    acc = lax.dot_general(
        x_ref[0], w_ref[...],
        dimension_numbers=(((0,), (0,)), ((), ())),   # contract channel dims
        preferred_element_type=jnp.float32,
    )
    o_ref[0] = (acc + b_ref[...]).astype(o_ref.dtype)


def _segformer_mlp_kernel_acc(x_ref, w_ref, b_ref, o_ref, acc_ref):
    """General k-tiled path (only used when C > one k-tile)."""
    k = pl.program_id(3)

    @pl.when(k == 0)
    def _():
        acc_ref[...] = jnp.zeros_like(acc_ref)

    acc_ref[...] += lax.dot_general(
        x_ref[0], w_ref[...],
        dimension_numbers=(((0,), (0,)), ((), ())),
        preferred_element_type=jnp.float32,
    )

    @pl.when(k == pl.num_programs(3) - 1)
    def _():
        o_ref[0] = (acc_ref[...] + b_ref[...]).astype(o_ref.dtype)


# ----------------------------------------------------------------------------
# Wrapper helpers
# ----------------------------------------------------------------------------
def _itemsize(dt):
    return jnp.dtype(dt).itemsize


def _pick_tile(dim, candidates):
    for c in candidates:
        if dim >= c and dim % c == 0:
            return c
    return dim  # full dimension (always a legal block size)


def _step_vmem_bytes(tm, tn, tk, x_bytes, w_bytes, o_bytes, k_steps):
    # BlockSpec double-buffers every operand; the f32 accumulator is only
    # allocated on the multi-k path.
    buffered = 2 * (tk * tm * x_bytes + tk * tn * w_bytes + tn * 4 + tm * tn * o_bytes)
    if k_steps > 1:
        buffered += tm * tn * 4
    return buffered


# ----------------------------------------------------------------------------
# Wrapper
# ----------------------------------------------------------------------------
def segformer_mlp(x_nchw, w, b, *, tm=None, tn=None, tk=None,
                  compute_dtype=jnp.bfloat16, out_dtype=None,
                  vmem_budget_bytes=12 * 1024 * 1024):
    """SegformerMLP forward.

    x_nchw: (B, C, H, W)
    w:      (C, Dout)  -- PyTorch nn.Linear weight transposed (weight.T)
    b:      (Dout,)
    returns (B, H*W, Dout) == proj(x.flatten(2).transpose(1, 2))
    """
    B, C, H, W = x_nchw.shape
    N = H * W
    Cin, Dout = w.shape
    assert Cin == C, "weight must be (C, Dout) == nn.Linear weight.T"
    out_dtype = out_dtype or x_nchw.dtype

    x_flat = x_nchw.reshape(B, C, N)   # free reshape, no data movement

    # bf16 GEMM (f32 accumulation) halves the dominant HBM input streams and
    # doubles MXU rate; keep the output in the caller's dtype for semantics.
    if compute_dtype is not None:
        x_flat = x_flat.astype(compute_dtype)
        w = w.astype(compute_dtype)
    b2 = b.reshape(1, Dout).astype(jnp.float32)

    # Pad the token axis to a lane multiple instead of falling back to a
    # full-N tile (which could exceed v7x's 64 MiB VMEM for large odd N).
    # Padded rows only produce bias values and are sliced off below.
    n_pad = -(-N // 128) * 128
    if n_pad != N:
        x_flat = jnp.pad(x_flat, ((0, 0), (0, 0), (0, n_pad - N)))

    xe, we, oe = _itemsize(x_flat.dtype), _itemsize(w.dtype), _itemsize(out_dtype)

    # Full output width whenever it is modest: x is then read from HBM once.
    if tn is None:
        tn = Dout if Dout <= 2048 else _pick_tile(Dout, (1024, 512, 256, 128))
    # Segformer channel counts (<= 1024) always fit one k-tile, selecting the
    # accumulator-free fused kernel.
    if tk is None:
        tk = C if C <= 1024 else _pick_tile(C, (512, 256))
    k_steps = C // tk

    # Largest lane-aligned token tile (<= 2048) dividing the padded token
    # count whose double-buffered working set stays inside a budget that is
    # safe even for v5e's 16 MiB scoped-VMEM default.
    if tm is None:
        tm = 128
        cand = 256
        while cand <= min(n_pad, 2048):
            if (n_pad % cand == 0 and
                    _step_vmem_bytes(cand, tn, tk, xe, we, oe, k_steps) <= vmem_budget_bytes):
                tm = cand
            cand += 128
        # v7x has two TensorCores: keep the parallel extent even when cheap.
        if (B * (n_pad // tm)) % 2 == 1 and tm % 256 == 0:
            tm //= 2

    gm, gn = n_pad // tm, Dout // tn

    footprint = _step_vmem_bytes(tm, tn, tk, xe, we, oe, k_steps)
    vmem_limit = None
    if footprint > (12 << 20):            # only override when defaults may not fit
        vmem_limit = min(48 << 20, footprint + (8 << 20))

    cost = pl.CostEstimate(
        flops=2 * B * n_pad * C * Dout,
        transcendentals=0,
        bytes_accessed=int(B * C * n_pad * xe * gn           # x re-read per j-tile
                           + C * Dout * we * max(1, B * gm)   # w re-streamed per (b, i)
                           + Dout * 4
                           + B * n_pad * Dout * oe),
    )

    if k_steps == 1:
        grid = (B, gm, gn)
        grid_spec = pltpu.PrefetchScalarGridSpec(
            num_scalar_prefetch=0,
            grid=grid,
            in_specs=[
                # x: (B, C, n_pad) -> (1, tk, tm) at (batch, 0, token-tile)
                pl.BlockSpec((1, tk, tm), lambda bb, i, j: (bb, 0, i)),
                # w: (C, Dout) -> (tk, tn)
                pl.BlockSpec((tk, tn), lambda bb, i, j: (0, j)),
                # bias: (1, Dout) -> (1, tn)
                pl.BlockSpec((1, tn), lambda bb, i, j: (0, j)),
            ],
            out_specs=pl.BlockSpec((1, tm, tn), lambda bb, i, j: (bb, i, j)),
        )
        kernel = _segformer_mlp_kernel_fused
        semantics = ("parallel", "parallel", "parallel")
    else:
        grid = (B, gm, gn, k_steps)
        grid_spec = pltpu.PrefetchScalarGridSpec(
            num_scalar_prefetch=0,
            grid=grid,
            in_specs=[
                pl.BlockSpec((1, tk, tm), lambda bb, i, j, k: (bb, k, i)),
                pl.BlockSpec((tk, tn), lambda bb, i, j, k: (k, j)),
                pl.BlockSpec((1, tn), lambda bb, i, j, k: (0, j)),
            ],
            out_specs=pl.BlockSpec((1, tm, tn), lambda bb, i, j, k: (bb, i, j)),
            scratch_shapes=[pltpu.VMEM((tm, tn), jnp.float32)],
        )
        kernel = _segformer_mlp_kernel_acc
        semantics = ("parallel", "parallel", "parallel", "arbitrary")

    out = pl.pallas_call(
        kernel,
        out_shape=jax.ShapeDtypeStruct((B, n_pad, Dout), out_dtype),
        grid_spec=grid_spec,
        compiler_params=pltpu.CompilerParams(
            dimension_semantics=semantics,
            vmem_limit_bytes=vmem_limit,
        ),
        cost_estimate=cost,
    )(x_flat, w, b2)

    if n_pad != N:
        out = out[:, :N, :]
    return out


# ----------------------------------------------------------------------------
if __name__ == "__main__":
    key = jax.random.PRNGKey(0)
    kx, kw, kb, kx2 = jax.random.split(key, 4)

    # ---- primary test: bf16 compute path, divisible token count -------------
    B, C, H, W = 2, 4, 16, 16
    Dout = 32
    x = jax.random.normal(kx, (B, C, H, W), jnp.float32)
    # nn.Linear-style init (trunc_normal-ish weights, small bias), stored as W.T.
    w = (0.02 * jax.random.truncated_normal(kw, -2.0, 2.0, (C, Dout))).astype(jnp.float32)
    b = (0.02 * jax.random.normal(kb, (Dout,))).astype(jnp.float32)

    out = segformer_mlp(x, w, b)
    out = jax.block_until_ready(out)

    ref = jnp.transpose(x.reshape(B, C, H * W), (0, 2, 1)) @ w + b
    assert out.shape == (B, H * W, Dout)
    assert bool(jnp.all(jnp.isfinite(out)))
    assert bool(jnp.allclose(out, ref, rtol=2e-2, atol=2e-2))

    # ---- secondary test: f32 path + non-divisible token count (padding) -----
    B2, C2, H2, W2 = 1, 4, 7, 9          # N = 63 -> padded to 128 internally
    x2 = jax.random.normal(kx2, (B2, C2, H2, W2), jnp.float32)
    out2 = jax.block_until_ready(segformer_mlp(x2, w, b, compute_dtype=None))
    ref2 = jnp.transpose(x2.reshape(B2, C2, H2 * W2), (0, 2, 1)) @ w + b
    assert out2.shape == (B2, H2 * W2, Dout)
    assert bool(jnp.all(jnp.isfinite(out2)))
    assert bool(jnp.allclose(out2, ref2, rtol=1e-3, atol=1e-3))

    print("KERNEL_OK")
</pallas_src>

<mosaic_0001>
module attributes {stable_mosaic.version = 11 : i64} {
  func.func @_segformer_mlp_kernel_fused(%arg0: i32, %arg1: i32, %arg2: i32, %arg3: memref<1x4x256xbf16, #tpu.memory_space<vmem>>, %arg4: memref<4x32xbf16, #tpu.memory_space<vmem>>, %arg5: memref<1x32xf32, #tpu.memory_space<vmem>>, %arg6: memref<1x256x32xf32, #tpu.memory_space<vmem>>) attributes {dimension_semantics = [#tpu.dimension_semantics<parallel>, #tpu.dimension_semantics<parallel>, #tpu.dimension_semantics<parallel>], iteration_bounds = array<i64: 2, 1, 1>, scalar_prefetch = 0 : i64, scratch_operands = 0 : i64, tpu.core_type = #tpu.core_type<tc>, window_params = [{transform_indices = @transform_0, window_bounds = array<i64: 1, 4, 256>}, {transform_indices = @transform_1, window_bounds = array<i64: 4, 32>}, {transform_indices = @transform_2, window_bounds = array<i64: 1, 32>}, {transform_indices = @transform_3, window_bounds = array<i64: 1, 256, 32>}]} {
    %c0 = arith.constant 0 : index
    %c0_0 = arith.constant 0 : index
    %c0_1 = arith.constant 0 : index
    %0 = vector.load %arg3[%c0, %c0_0, %c0_1] : memref<1x4x256xbf16, #tpu.memory_space<vmem>>, vector<1x4x256xbf16>
    %1 = vector.shape_cast %0 : vector<1x4x256xbf16> to vector<4x256xbf16>
    %c0_2 = arith.constant 0 : index
    %c0_3 = arith.constant 0 : index
    %2 = vector.load %arg4[%c0_2, %c0_3] : memref<4x32xbf16, #tpu.memory_space<vmem>>, vector<4x32xbf16>
    %cst = arith.constant dense<0.000000e+00> : vector<256x32xf32>
    %3 = tpu.matmul %1, %2, %cst {dimension_numbers = #tpu.dot_dimension_numbers<[0], [0], [1], [1], [0, 1, 1, 1], [], []>} : vector<4x256xbf16>, vector<4x32xbf16>, vector<256x32xf32> -> vector<256x32xf32>
    %c0_4 = arith.constant 0 : index
    %c0_5 = arith.constant 0 : index
    %4 = vector.load %arg5[%c0_4, %c0_5] : memref<1x32xf32, #tpu.memory_space<vmem>>, vector<1x32xf32>
    %5 = vector.broadcast %4 : vector<1x32xf32> to vector<256x32xf32>
    %6 = arith.addf %3, %5 : vector<256x32xf32>
    %c0_6 = arith.constant 0 : index
    %c0_7 = arith.constant 0 : index
    %c0_8 = arith.constant 0 : index
    %7 = vector.load %arg6[%c0_6, %c0_7, %c0_8] : memref<1x256x32xf32, #tpu.memory_space<vmem>>, vector<1x256x32xf32>
    %8 = vector.shape_cast %7 : vector<1x256x32xf32> to vector<256x32xf32>
    %9 = vector.shape_cast %6 : vector<256x32xf32> to vector<1x256x32xf32>
    tpu.vector_store %arg6[%c0_6, %c0_7, %c0_8], %9 {strides = array<i32>} : memref<1x256x32xf32, #tpu.memory_space<vmem>>, vector<1x256x32xf32>,
    return
  }
  func.func @transform_0(%arg0: i32, %arg1: i32, %arg2: i32) -> (i32, i32, i32) {
    %c0_i32 = arith.constant 0 : i32
    %c0_i32_0 = arith.constant 0 : i32
    return %arg0, %c0_i32, %arg1 : i32, i32, i32
  }
  func.func @transform_1(%arg0: i32, %arg1: i32, %arg2: i32) -> (i32, i32) {
    %c0_i32 = arith.constant 0 : i32
    %c0_i32_0 = arith.constant 0 : i32
    return %c0_i32, %arg2 : i32, i32
  }
  func.func @transform_2(%arg0: i32, %arg1: i32, %arg2: i32) -> (i32, i32) {
    %c0_i32 = arith.constant 0 : i32
    %c0_i32_0 = arith.constant 0 : i32
    return %c0_i32, %arg2 : i32, i32
  }
  func.func @transform_3(%arg0: i32, %arg1: i32, %arg2: i32) -> (i32, i32, i32) {
    %c0_i32 = arith.constant 0 : i32
    return %arg0, %arg1, %arg2 : i32, i32, i32
  }
}

</mosaic_0001>

<bundles_post_ra>
// kernel: tpu_custom_call.1
= control target key start
LH: loop header
LB: loop body
LE: loop exit
PB: predicated region body
PF: predicated region fallthrough
CT: control target
= control target key end

     0   :  { %8 = vsyncpa [#allocation3], 0  ;;  %s1086_s0 = inlined_call_operand.hbm [shape: bf16[2,4,256], index: 0, kind: input, shape index: {}]   ;;  %s1087_s1 = inlined_call_operand.hbm [shape: bf16[4,32], index: 1, kind: input, shape index: {}]   ;;  %s1088_s2 = inlined_call_operand.vmem [shape: f32[1,32], index: 2, kind: input, shape index: {}]   ;;  %s1089_s3 = inlined_call_operand.vmem [shape: f32[2,256,32], index: 3, kind: output, shape index: {}]  }
   0x1   :  { %10 = vsyncpa [#allocation3 + $0x1], 0 }
   0x2   :  { %11 = vsyncpa [#allocation5], 0  ;;  %s856_s12 = smov 0   ;;  %s858_s13 = smov 0  }
   0x3   :  { %s860_s14 = smov 0   ;;  %s862_s15 = smov 0  }
   0x4   :  { %s864_s16 = smov 0   ;;  %s866_s17 = smov 0  }
   0x5 LB: > { %s614_s18 = sadd.s32 4294967295, %s833_s17   ;;  %p58_p0 = scmp.ne.s32.totalorder %s817_s13, %s813_s12  ;;  %s833_s17 = sphi %s866_s17, %s17_s17   ;;  %s829_s16 = sphi %s864_s16, %s1098_s16   ;;  %s825_s15 = sphi %s862_s15, %s1097_s15   ;;  %s821_s14 = sphi %s860_s14, %s1096_s14   ;;  %s817_s13 = sphi %s858_s13, %s1095_s13   ;;  %s813_s12 = sphi %s856_s12, %s1094_s12  }
   0x6   : > { %p886_p1 = scmp.eq.s32.totalorder %s614_s18, 0  ;;  %p616_p2 = scmp.ge.s32.totalorder %s833_s17, 1 }
   0x7   : > { %p151_p3 = scmp.lt.s32.totalorder %s833_s17, 3  ;;  %s165_s23 = sshll.u32 %s1087_s1, 4  ;;  %s166_s23 = int_to_ptr.hbm [resolvable:$true] %s165_s23 }
   0x8   : > { %p894_p4 = por %p886_p1, %p58_p0  ;;  %s835_s25 = smov [#allocation4]  }
   0x9   : > { %p901_p5 = pnand %p616_p2, %p151_p3  ;;  %s167_s26 = sshll.u32 %s835_s25, 4  ;;  %s168_s26 = int_to_ptr.vmem [resolvable:$true] %s167_s26 }
   0xa   : > { %s36_s27 = sadd.s32 1, %s829_s16  ;;  %p52_p9 = scmp.ne.s32.totalorder %s821_s14, %s817_s13 }
   0xb   : > { %p657_p6 = pneg %p901_p5  ;;  %p38_p8 = scmp.ge.s32.totalorder %s36_s27, 2 }
   0xc   : > { %p53_p10 = scmp.eq.s32.totalorder %s833_s17, 0  ;;  %s45_s28 = sadd.s32 1, %s821_s14 }
   0xd   : > { %p658_p7 = pnand %p657_p6, %p886_p1  ;;  %s1100_s27 = smov (%p38_p8, %s36_s27), 0 }
   0xe   : > { %p916_p11 = por %p53_p10, %p52_p9  ;;  %s40_s30 = ssub.s32 %s829_s16, %s1100_s27 }
   0xf   : > { %660 = dma.hbm_to_vmem [thread:$0]  (!%p658_p7), %s166_s23, 32, %s168_s26, [#allocation5]  }
  0x10   : > { %s184_s4 = sand.u32 1, %s821_s14   ;;  %p43_p12 = scmp.eq.s32.totalorder %s40_s30, 0 }
  0x11   : > { %p666_p13 = scmp.lt.s32.totalorder %s833_s17, 2  ;;  %s620_s5 = sshll.u32 %s184_s4, 2 }
  0x12   : > { %s646_s6 = sshll.u32 %s829_s16, 2  ;;  %s188_s12 = scalar_lea.vmem [#allocation2], %s620_s5 }
  0x13   : > { %s926_s7 = scalar_select %p43_p12, %s821_s14, %s45_s28  }
  0x14   : > { %s195_s10 = scalar_lea.hbm %s1086_s0, %s646_s6  ;;  %s199_s18 = sshll.u32 %s188_s12, 4  ;;  %s200_s18 = int_to_ptr.vmem [resolvable:$true] %s199_s18 }
  0x15   : > { %s197_s11 = sshll.u32 %s195_s10, 4  ;;  %p662_p0 = pnand %p666_p13, %p916_p11  ;;  %s198_s11 = int_to_ptr.hbm [resolvable:$true] %s197_s11 }
  0x16   : > { %s185_s21 = scalar_lea.sflag [#allocation3], %s184_s4  ;;  %208 = sbr.rel (%p901_p5) target bundleno = 475 (0x1db), region = 32 }
  0x17   : > { %664 = dma.hbm_to_vmem [thread:$0]  (!%p662_p0), %s198_s11, 64, %s200_s18, %s185_s21  }
  0x18   : > { %s210_s22 = sand.u32 (!%p901_p5), 1, %s817_s13  }
  0x19   : > { %s624_s23 = sshll.u32 (!%p901_p5), %s210_s22, 2  ;;  %s211_s25 = scalar_lea.sflag (!%p901_p5), [#allocation3], %s210_s22 }
  0x1a   : > { %s214_s26 = scalar_lea.vmem (!%p901_p5), [#allocation2], %s624_s23 }
  0x1b   : > { %804 = dma.done.wait (%p894_p4), %s211_s25, 64  }
  0x1c   : > { %806 = vsyncadd (%p894_p4), %s211_s25, 4294967232 }
  0x1d   : > { %808 = dma.done.wait (%p886_p1), [#allocation5], 32  }
  0x1e   : > { %810 = vsyncadd (%p886_p1), [#allocation5], 4294967264  ;;  %vm356_vm0 = vcmask 1041408   ;;  %v271_v0 = vld [vmem:[%s214_s26] sm:$0xf]  ;;  %vm307_vm1 = vcmask 31744  }
  0x1f   : > { %v272_v1 = vld [vmem:[#allocation4] sm:$0x3]  ;;  %278 = vst [vmem:[#allocation1] ss:$4 sm:$0xff] %v271_v0  ;;  %p258_p1 = scmp.lt.s32.totalorder %s825_s15, 1  ;;  %vm449_vm2 = vcmask 261120  }
  0x20   : > { %v358_v2 = vsel %vm356_vm0, %v272_v1, 0  ;;  %v965_v21 = vld [vmem:[%s1088_s2] ss:$0 sm:$0xff] }
  0x21   : > { %367 = vmatpush.bf16.msra.mxu0 %v358_v2  ;;  %649 = vmatpush.bf16.msra.mxu2 %v358_v2  ;;  %s1102_s15 = smov (!%p258_p1, %s825_s15), 1 }
  0x22   : > { %648 = vmatpush.bf16.msra.mxu1 %v358_v2  ;;  %650 = vmatpush.bf16.msra.mxu3 %v358_v2  ;;  %s647_s19 = sshll.u32 %s1102_s15, 8 }
  0x23   : > { %s970_s30 = scalar_lea.vmem %s1089_s3, %s647_s19 }
  0x26   : > { %v279_v3 = vld.sshfl [vmem:[#allocation1] sm:$0xff pattern:$0x73625140]  ;;  %v280_v4 = vld.sshfl [vmem:[#allocation1 + $0x8] sm:$0xff pattern:$0x73625140] }
  0x27   : > { %283 = vxpose.binary.xlu0.c.b16.start.end [1/2] (short) %v280_v4, %v279_v3, 128 }
  0xd3   : > { %v291_v5 = vpop.trf.xlu0 }
  0xd4   : > { %628 = vmatmul.msk.bf16.vlgmr.msra.gmra.mxu0 %vm307_vm1, %v291_v5 }
  0xdb   : > { %v292_v6 = vpop.trf.xlu0 }
  0xdc   : > { %636 = vmatmul.msk.bf16.vlgmr.msra.gmra.mxu2 %vm307_vm1, %v292_v6 }
  0xe3   : > { %v293_v7 = vpop.trf.xlu0 }
  0xe4   : > { %629 = vmatmul.msk.bf16.gmra.mxu0 %vm307_vm1, %v293_v7 }
  0xeb   : > { %v294_v8 = vpop.trf.xlu0 }
  0xec   : > { %637 = vmatmul.msk.bf16.gmra.mxu2 %vm307_vm1, %v294_v8 }
  0xf3   : > { %v295_v9 = vpop.trf.xlu0 }
  0xf4   : > { %630 = vmatmul.msk.bf16.gmra.mxu0 %vm307_vm1, %v295_v9 }
  0xfb   : > { %v296_v10 = vpop.trf.xlu0 }
  0xfc   : > { %638 = vmatmul.msk.bf16.gmra.mxu2 %vm307_vm1, %v296_v10 }
 0x103   : > { %v297_v11 = vpop.trf.xlu0 }
 0x104   : > { %631 = vmatmul.msk.bf16.gmra.mxu0 %vm307_vm1, %v297_v11 }
 0x10b   : > { %v298_v12 = vpop.trf.xlu0 }
 0x10c   : > { %639 = vmatmul.msk.bf16.gmra.mxu2 %vm307_vm1, %v298_v12 }
 0x113   : > { %v299_v13 = vpop.trf.xlu0 }
 0x114   : > { %632 = vmatmul.msk.bf16.vlgmr.msra.gmra.mxu1 %vm307_vm1, %v299_v13 }
 0x11b   : > { %v300_v14 = vpop.trf.xlu0 }
 0x11c   : > { %640 = vmatmul.msk.bf16.vlgmr.msra.gmra.mxu3 %vm307_vm1, %v300_v14 }
 0x123   : > { %v301_v15 = vpop.trf.xlu0 }
 0x124   : > { %633 = vmatmul.msk.bf16.gmra.mxu1 %vm307_vm1, %v301_v15 }
 0x12b   : > { %v302_v16 = vpop.trf.xlu0 }
 0x12c   : > { %641 = vmatmul.msk.bf16.gmra.mxu3 %vm307_vm1, %v302_v16 }
 0x133   : > { %v303_v17 = vpop.trf.xlu0 }
 0x134   : > { %634 = vmatmul.msk.bf16.gmra.mxu1 %vm307_vm1, %v303_v17 }
 0x13b   : > { %v304_v18 = vpop.trf.xlu0 }
 0x13c   : > { %642 = vmatmul.msk.bf16.gmra.mxu3 %vm307_vm1, %v304_v18 }
 0x143   : > { %v305_v19 = vpop.trf.xlu0 }
 0x144   : > { %635 = vmatmul.msk.bf16.gmra.mxu1 %vm307_vm1, %v305_v19 }
 0x14b   : > { %v306_v20 = vpop.trf.xlu0 }
 0x14c   : > { %643 = vmatmul.msk.bf16.gmra.mxu3 %vm307_vm1, %v306_v20 }
 0x151   : > { %v369_v22 = vpop.f32.mrf.mxu0 }
 0x152   : > { %v370_v23 = vadd.f32 %v965_v21, %v369_v22 }
 0x154   : > { %450 = vst.msk [vmem:[%s970_s30] sm:$0xff] %vm449_vm2, %v370_v23 }
 0x159   : > { %v371_v24 = vpop.f32.mrf.mxu0 }
 0x15a   : > { %v372_v25 = vadd.f32 %v965_v21, %v371_v24 }
 0x15c   : > { %451 = vst.msk [vmem:[%s970_s30 + $0x8] sm:$0xff] %vm449_vm2, %v372_v25 }
 0x15f   : > { %v409_v26 = vpop.f32.mrf.mxu2 }
 0x160   : > { %v410_v27 = vadd.f32 %v965_v21, %v409_v26 }
 0x161   : > { %v374_v28 = vpop.f32.mrf.mxu0 }
 0x162   : > { %466 = vst.msk [vmem:[%s970_s30 + $0x80] sm:$0xff] %vm449_vm2, %v410_v27  ;;  %v375_v29 = vadd.f32 %v965_v21, %v374_v28 }
 0x164   : > { %452 = vst.msk [vmem:[%s970_s30 + $0x10] sm:$0xff] %vm449_vm2, %v375_v29 }
 0x167   : > { %v411_v30 = vpop.f32.mrf.mxu2 }
 0x168   : > { %v412_v31 = vadd.f32 %v965_v21, %v411_v30 }
 0x169   : > { %v376_v32 = vpop.f32.mrf.mxu0 }
 0x16a   : > { %467 = vst.msk [vmem:[%s970_s30 + $0x88] sm:$0xff] %vm449_vm2, %v412_v31  ;;  %v377_v33 = vadd.f32 %v965_v21, %v376_v32 }
 0x16c   : > { %453 = vst.msk [vmem:[%s970_s30 + $0x18] sm:$0xff] %vm449_vm2, %v377_v33 }
 0x16f   : > { %v414_v34 = vpop.f32.mrf.mxu2 }
 0x170   : > { %v415_v35 = vadd.f32 %v965_v21, %v414_v34 }
 0x171   : > { %v379_v36 = vpop.f32.mrf.mxu0 }
 0x172   : > { %468 = vst.msk [vmem:[%s970_s30 + $0x90] sm:$0xff] %vm449_vm2, %v415_v35  ;;  %v380_v37 = vadd.f32 %v965_v21, %v379_v36 }
 0x174   : > { %454 = vst.msk [vmem:[%s970_s30 + $0x20] sm:$0xff] %vm449_vm2, %v380_v37 }
 0x177   : > { %v416_v38 = vpop.f32.mrf.mxu2 }
 0x178   : > { %v417_v39 = vadd.f32 %v965_v21, %v416_v38 }
 0x179   : > { %v381_v40 = vpop.f32.mrf.mxu0 }
 0x17a   : > { %469 = vst.msk [vmem:[%s970_s30 + $0x98] sm:$0xff] %vm449_vm2, %v417_v39  ;;  %v382_v41 = vadd.f32 %v965_v21, %v381_v40 }
 0x17c   : > { %455 = vst.msk [vmem:[%s970_s30 + $0x28] sm:$0xff] %vm449_vm2, %v382_v41 }
 0x17f   : > { %v419_v42 = vpop.f32.mrf.mxu2 }
 0x180   : > { %v420_v43 = vadd.f32 %v965_v21, %v419_v42 }
 0x181   : > { %v384_v44 = vpop.f32.mrf.mxu0 }
 0x182   : > { %470 = vst.msk [vmem:[%s970_s30 + $0xa0] sm:$0xff] %vm449_vm2, %v420_v43  ;;  %v385_v45 = vadd.f32 %v965_v21, %v384_v44 }
 0x184   : > { %456 = vst.msk [vmem:[%s970_s30 + $0x30] sm:$0xff] %vm449_vm2, %v385_v45 }
 0x187   : > { %v421_v46 = vpop.f32.mrf.mxu2 }
 0x188   : > { %v422_v47 = vadd.f32 %v965_v21, %v421_v46 }
 0x189   : > { %v386_v48 = vpop.f32.mrf.mxu0 }
 0x18a   : > { %471 = vst.msk [vmem:[%s970_s30 + $0xa8] sm:$0xff] %vm449_vm2, %v422_v47  ;;  %v387_v49 = vadd.f32 %v965_v21, %v386_v48 }
 0x18c   : > { %457 = vst.msk [vmem:[%s970_s30 + $0x38] sm:$0xff] %vm449_vm2, %v387_v49 }
 0x18f   : > { %v424_v50 = vpop.f32.mrf.mxu2 }
 0x190   : > { %v425_v51 = vadd.f32 %v965_v21, %v424_v50 }
 0x191   : > { %v389_v52 = vpop.f32.mrf.mxu1 }
 0x192   : > { %472 = vst.msk [vmem:[%s970_s30 + $0xb0] sm:$0xff] %vm449_vm2, %v425_v51  ;;  %v390_v53 = vadd.f32 %v965_v21, %v389_v52 }
 0x194   : > { %458 = vst.msk [vmem:[%s970_s30 + $0x40] sm:$0xff] %vm449_vm2, %v390_v53 }
 0x197   : > { %v426_v54 = vpop.f32.mrf.mxu2 }
 0x198   : > { %v427_v55 = vadd.f32 %v965_v21, %v426_v54 }
 0x199   : > { %v391_v56 = vpop.f32.mrf.mxu1 }
 0x19a   : > { %473 = vst.msk [vmem:[%s970_s30 + $0xb8] sm:$0xff] %vm449_vm2, %v427_v55  ;;  %v392_v57 = vadd.f32 %v965_v21, %v391_v56 }
 0x19c   : > { %459 = vst.msk [vmem:[%s970_s30 + $0x48] sm:$0xff] %vm449_vm2, %v392_v57 }
 0x19f   : > { %v429_v58 = vpop.f32.mrf.mxu3 }
 0x1a0   : > { %v430_v59 = vadd.f32 %v965_v21, %v429_v58 }
 0x1a1   : > { %v394_v60 = vpop.f32.mrf.mxu1 }
 0x1a2   : > { %474 = vst.msk [vmem:[%s970_s30 + $0xc0] sm:$0xff] %vm449_vm2, %v430_v59  ;;  %v395_v61 = vadd.f32 %v965_v21, %v394_v60 }
 0x1a4   : > { %460 = vst.msk [vmem:[%s970_s30 + $0x50] sm:$0xff] %vm449_vm2, %v395_v61 }
 0x1a7   : > { %v431_v62 = vpop.f32.mrf.mxu3 }
 0x1a8   : > { %v432_v63 = vadd.f32 %v965_v21, %v431_v62 }
 0x1a9   : > { %v396_v0 = vpop.f32.mrf.mxu1 }
 0x1aa   : > { %475 = vst.msk [vmem:[%s970_s30 + $0xc8] sm:$0xff] %vm449_vm2, %v432_v63  ;;  %v397_v1 = vadd.f32 %v965_v21, %v396_v0 }
 0x1ac   : > { %461 = vst.msk [vmem:[%s970_s30 + $0x58] sm:$0xff] %vm449_vm2, %v397_v1 }
 0x1af   : > { %v434_v2 = vpop.f32.mrf.mxu3 }
 0x1b0   : > { %v435_v3 = vadd.f32 %v965_v21, %v434_v2 }
 0x1b1   : > { %v399_v4 = vpop.f32.mrf.mxu1 }
 0x1b2   : > { %476 = vst.msk [vmem:[%s970_s30 + $0xd0] sm:$0xff] %vm449_vm2, %v435_v3  ;;  %v400_v5 = vadd.f32 %v965_v21, %v399_v4 }
 0x1b4   : > { %462 = vst.msk [vmem:[%s970_s30 + $0x60] sm:$0xff] %vm449_vm2, %v400_v5 }
 0x1b7   : > { %v436_v6 = vpop.f32.mrf.mxu3 }
 0x1b8   : > { %v437_v7 = vadd.f32 %v965_v21, %v436_v6 }
 0x1b9   : > { %v401_v8 = vpop.f32.mrf.mxu1 }
 0x1ba   : > { %477 = vst.msk [vmem:[%s970_s30 + $0xd8] sm:$0xff] %vm449_vm2, %v437_v7  ;;  %v402_v9 = vadd.f32 %v965_v21, %v401_v8 }
 0x1bc   : > { %463 = vst.msk [vmem:[%s970_s30 + $0x68] sm:$0xff] %vm449_vm2, %v402_v9 }
 0x1bf   : > { %v439_v10 = vpop.f32.mrf.mxu3 }
 0x1c0   : > { %v440_v11 = vadd.f32 %v965_v21, %v439_v10 }
 0x1c1   : > { %v404_v12 = vpop.f32.mrf.mxu1 }
 0x1c2   : > { %478 = vst.msk [vmem:[%s970_s30 + $0xe0] sm:$0xff] %vm449_vm2, %v440_v11  ;;  %v405_v13 = vadd.f32 %v965_v21, %v404_v12 }
 0x1c4   : > { %464 = vst.msk [vmem:[%s970_s30 + $0x70] sm:$0xff] %vm449_vm2, %v405_v13 }
 0x1c7   : > { %v441_v14 = vpop.f32.mrf.mxu3 }
 0x1c8   : > { %v442_v15 = vadd.f32 %v965_v21, %v441_v14 }
 0x1c9   : > { %v406_v16 = vpop.f32.mrf.mxu1 }
 0x1ca   : > { %479 = vst.msk [vmem:[%s970_s30 + $0xe8] sm:$0xff] %vm449_vm2, %v442_v15  ;;  %v407_v17 = vadd.f32 %v965_v21, %v406_v16 }
 0x1cc   : > { %465 = vst.msk [vmem:[%s970_s30 + $0x78] sm:$0xff] %vm449_vm2, %v407_v17 }
 0x1cf   : > { %v444_v18 = vpop.f32.mrf.mxu3 }
 0x1d0   : > { %v445_v19 = vadd.f32 %v965_v21, %v444_v18 }
 0x1d2   : > { %480 = vst.msk [vmem:[%s970_s30 + $0xf0] sm:$0xff] %vm449_vm2, %v445_v19 }
 0x1d7   : > { %v446_v20 = vpop.f32.mrf.mxu3 }
 0x1d8   : > { %v447_v22 = vadd.f32 %v965_v21, %v446_v20 }
 0x1da   : > { %481 = vst.msk [vmem:[%s970_s30 + $0xf8] sm:$0xff] %vm449_vm2, %v447_v22 }
 0x1db PF: > { %s17_s17 = sadd.s32 1, %s833_s17   ;;  %s1094_s12 = smov %s817_s13 }
 0x1dc   : > { %p14_p2 = scmp.ge.s32.totalorder %s17_s17, 4   ;;  %s1095_s13 = smov %s821_s14 }
 0x1dd   : > { %s1096_s14 = smov %s926_s7  ;;  %s1097_s15 = smov %s829_s16 }
 0x1de   : > { %s1098_s16 = smov %s1100_s27  ;;  %16 = sbr.rel (!%p14_p2) target bundleno = 5 (0x5), region = 80 }
 0x1e3   :  { %518 = vsyncpa [#allocation3], 1 }
 0x1e4   :  { %520 = vsyncpa [#allocation3 + $0x1], 1 }
 0x1e5   :  { %521 = vsyncpa [#allocation5], 1 }

</bundles_post_ra>
